<compile_context>
chip_gen: v7x
topology: tpu7x:2x2x1
jax: 0.10.0
libtpu: 0.0.40
codegen_flags: <defaults>
</compile_context>

<pallas_src>
import functools
import math

import jax
import jax.numpy as jnp
from jax import lax
from jax.experimental import pallas as pl
from jax.experimental.pallas import tpu as pltpu


def _kl_kernel(x_ref, gt_ref, out_ref, *, log_r, use_erasure, block_rows,
               tiles_per_split, tiles_total, valid_rows_last):
    """Accumulates one (block_rows, 128) tile of masked KL terms into a
    lane-dense (8, 128) partial-sum block resident in out_ref."""
    s = pl.program_id(0)      # partial-sum split ("parallel": 2-TC shard on v7x)
    j = pl.program_id(1)      # streaming tile axis ("arbitrary": reduction)

    @pl.when(j == 0)
    def _init():
        out_ref[...] = jnp.zeros_like(out_ref)

    tile = s * tiles_per_split + j
    last = tiles_total - 1

    def _accumulate(mask_tail):
        x = x_ref[...].astype(jnp.float32)    # in-kernel cast: bf16 inputs halve DMA
        gt = gt_ref[...].astype(jnp.float32)
        pos = gt > 0.0                         # xlogy guard: gt == 0 contributes 0
        logdiff = jnp.log(jnp.where(pos, gt, 1.0)) - x   # one EUP op, reused below
        term = jnp.where(pos, gt * logdiff, 0.0)
        if use_erasure and log_r is not None:
            # gt / exp(x) > r  <=>  log(gt) - x > log(r)   (gt > 0, r > 0).
            term = jnp.where(logdiff > log_r, term, 0.0)
        if mask_tail and valid_rows_last < block_rows:
            # Static (compile-time-constant) mask over stale VMEM rows past the
            # array extent of the final ragged tile.  Elements that were merely
            # zero-padded to a 128-lane multiple are already zeroed by the
            # `pos` guard (padded gt == 0), so only whole rows need masking.
            row = lax.broadcasted_iota(jnp.int32, term.shape, 0)
            term = jnp.where(row < valid_rows_last, term, 0.0)
        # VALU-only partial reduce to one (8,128) vreg per step; the final
        # cross-lane (XLU) reduce is done on the tiny output in the wrapper.
        out_ref[...] += term.reshape(-1, 8, 128).sum(axis=0)

    @pl.when(tile < last)
    def _steady():                 # fully in-bounds tiles: no per-element mask
        _accumulate(mask_tail=False)

    @pl.when(tile == last)
    def _tail():                   # final (possibly ragged) tile
        _accumulate(mask_tail=True)
    # tile > last: clamped duplicate trailing tile (odd tiles_total split two
    # ways) contributes nothing and is skipped entirely.


def _num_tensorcores():
    """Best-effort TensorCore count of the default device (v7x/v4/v5p: 2)."""
    try:
        kind = jax.devices()[0].device_kind.lower().replace(" ", "")
    except Exception:
        return 1
    if "v7" in kind or "v4" in kind or "v5p" in kind:
        return 2
    return 1      # v5e / v6e / unknown: assume single TensorCore


def _kl_loss_jax(x, gt, use_erasure, r):
    """Plain-XLA path for tiny inputs (pallas_call launch overhead dominates)."""
    x = x.reshape(-1).astype(jnp.float32)
    gt = gt.reshape(-1).astype(jnp.float32)
    pos = gt > 0.0
    logdiff = jnp.log(jnp.where(pos, gt, 1.0)) - x
    term = jnp.where(pos, gt * logdiff, 0.0)
    if use_erasure and float(r) > 0.0:
        term = jnp.where(logdiff > math.log(float(r)), term, 0.0)
    return jnp.sum(term)


def kl_loss_pallas(x, ground_truth, *, use_erasure=False, r=3.0,
                   block_rows=4096, num_splits=None,
                   min_pallas_elements=100_000):
    x = x.reshape(-1)
    gt = ground_truth.reshape(-1)
    n = x.shape[0]
    assert gt.shape[0] == n

    # Production-sized calls (~249 countries) are launch-latency dominated; a
    # pallas_call plus a separate reduce is pure overhead there, so fall back
    # to plain XLA below a threshold.  Pass min_pallas_elements=0 to force the
    # Pallas path (used in the tests below).
    if n < int(min_pallas_elements):
        return _kl_loss_jax(x, gt, use_erasure, r)

    # Pad only to a lane multiple (128), never to the tile size; padded gt == 0
    # entries contribute 0 via the xlogy guard.  Inputs keep their dtype (bf16
    # inputs halve HBM traffic on this bandwidth-bound kernel); the f32 cast
    # happens in-kernel.
    pad = (-n) % 128
    if pad:
        x = jnp.pad(x, (0, pad))
        gt = jnp.pad(gt, (0, pad))
    rows = (n + pad) // 128
    x2 = x.reshape(rows, 128)       # contiguous reshape: no extra HBM copy
    gt2 = gt.reshape(rows, 128)

    # Streaming tile: multiple of 8 sublanes, default 4096 rows (2 MiB per f32
    # block -> 8 MiB total with double buffering of both inputs), hard-capped
    # at 8192 rows so the pipeline stays well under the ~32 MiB default scoped
    # VMEM on every generation (v7x has only 64 MiB physical VMEM per TC).
    tr = min(int(block_rows), 8192, ((rows + 7) // 8) * 8)
    tr = max(8, ((tr + 7) // 8) * 8)
    tiles_total = pl.cdiv(rows, tr)

    # Partial-sum splits: only worthwhile on chips with 2 TensorCores and only
    # when the stream is long enough (>= 8 tiles) that a duplicated trailing
    # tile is amortized.  On 1-TC chips (v5e/v6e) the split is a serial loop,
    # i.e. pure overhead, so keep it at 1 there.
    if num_splits is None:
        num_splits = 2 if (_num_tensorcores() >= 2 and tiles_total >= 8) else 1
    num_splits = max(1, min(int(num_splits), tiles_total))
    tiles_per_split = pl.cdiv(tiles_total, num_splits)

    def in_map(s, j):
        # Clamp so a duplicated trailing tile (odd tiles_total split two ways)
        # still DMAs in-bounds data; its contribution is skipped in the kernel.
        t = jnp.minimum(s * tiles_per_split + j, tiles_total - 1)
        return (t, 0)

    kernel = functools.partial(
        _kl_kernel,
        log_r=(math.log(float(r)) if (use_erasure and float(r) > 0.0) else None),
        use_erasure=bool(use_erasure),
        block_rows=tr,
        tiles_per_split=tiles_per_split,
        tiles_total=tiles_total,
        valid_rows_last=rows - (tiles_total - 1) * tr,
    )

    itemsize = x2.dtype.itemsize
    out = pl.pallas_call(
        kernel,
        out_shape=jax.ShapeDtypeStruct((num_splits * 8, 128), jnp.float32),
        grid_spec=pltpu.PrefetchScalarGridSpec(
            num_scalar_prefetch=0,
            grid=(num_splits, tiles_per_split),
            in_specs=[
                pl.BlockSpec((tr, 128), in_map),
                pl.BlockSpec((tr, 128), in_map),
            ],
            out_specs=pl.BlockSpec((8, 128), lambda s, j: (s, 0)),
        ),
        # TODO(synk): on v7x verify "parallel" really shards the split axis
        # across both TensorCores; if not, switch that axis to CORE_PARALLEL.
        compiler_params=pltpu.CompilerParams(
            dimension_semantics=("parallel", "arbitrary")),
        cost_estimate=pl.CostEstimate(
            flops=6 * n,
            transcendentals=n,
            bytes_accessed=int(2 * rows * 128 * itemsize
                               + num_splits * 8 * 128 * 4)),
    )(x2, gt2)

    # Final cross-lane reduce of the tiny (num_splits*8, 128) partial sums.
    # KLDivLoss(reduction='batchmean') divides by the batch size of
    # x.reshape(1, -1), which is 1 -> no extra division.
    return jnp.sum(out)


def kl_loss_ref(x, ground_truth, *, use_erasure=False, r=3.0):
    """Pure-JAX reference mirroring the PyTorch module (gt == 0 contributes 0,
    matching torch.nn.KLDivLoss's xlogy convention)."""
    x = x.reshape(-1).astype(jnp.float32)
    gt = ground_truth.reshape(-1).astype(jnp.float32)
    pos = gt > 0.0
    term = jnp.where(pos, gt * (jnp.log(jnp.where(pos, gt, 1.0)) - x), 0.0)
    if use_erasure:
        term = jnp.where(gt / jnp.exp(x) > r, term, 0.0)
    return jnp.sum(term)


if __name__ == "__main__":
    failures = []

    def check(tag, got, want, atol=1e-5, rtol=1e-5):
        got = jax.block_until_ready(got)
        want = jax.block_until_ready(want)
        if not jnp.allclose(got, want, rtol=rtol, atol=atol):
            failures.append(f"{tag}: got={got}, want={want}")

    # ~"countries": 249 entries; ground truth is a proper probability vector,
    # x are (aggregated) model log-probabilities.
    N = 249
    k_gt, k_x = jax.random.split(jax.random.PRNGKey(0))
    ground_truth = jax.nn.softmax(jax.random.normal(k_gt, (N,), jnp.float32))
    x = jax.nn.log_softmax(jax.random.normal(k_x, (N,), jnp.float32))

    for use_erasure in (False, True):
        want = kl_loss_ref(x, ground_truth, use_erasure=use_erasure, r=3.0)
        # Forced Pallas path (single ragged tile).
        check(f"pallas-small erasure={use_erasure}",
              kl_loss_pallas(x, ground_truth, use_erasure=use_erasure, r=3.0,
                             min_pallas_elements=0),
              want)
        # Default path for tiny N (pure-JAX fallback).
        check(f"fallback erasure={use_erasure}",
              kl_loss_pallas(x, ground_truth, use_erasure=use_erasure, r=3.0),
              want)

    # bf16 inputs (halved DMA bytes; the kernel casts to f32 internally).
    x_bf = x.astype(jnp.bfloat16)
    gt_bf = ground_truth.astype(jnp.bfloat16)
    check("pallas-bf16",
          kl_loss_pallas(x_bf, gt_bf, use_erasure=False, r=3.0,
                         min_pallas_elements=0),
          kl_loss_ref(x_bf, gt_bf, use_erasure=False, r=3.0),
          atol=1e-3, rtol=1e-3)

    # Exercise the tiled paths (steady-state tiles, ragged tail mask, clamped
    # duplicate trailing tile, 1- vs 2-way partial-sum splits) with a
    # deliberately tiny block size.
    N2 = 5000
    k_gt2, k_x2 = jax.random.split(jax.random.PRNGKey(1))
    gt_big = jax.nn.softmax(jax.random.normal(k_gt2, (N2,), jnp.float32))
    x_big = jax.nn.log_softmax(jax.random.normal(k_x2, (N2,), jnp.float32))
    for use_erasure in (False, True):
        want = kl_loss_ref(x_big, gt_big, use_erasure=use_erasure, r=3.0)
        for splits in (1, 2):
            got = kl_loss_pallas(x_big, gt_big, use_erasure=use_erasure, r=3.0,
                                 block_rows=16, num_splits=splits,
                                 min_pallas_elements=0)
            check(f"tiled erasure={use_erasure} splits={splits}", got, want)

    if failures:
        for msg in failures:
            print("MISMATCH", msg)
    else:
        print("KERNEL_OK")
</pallas_src>

<mosaic_0001>
module attributes {stable_mosaic.version = 11 : i64} {
  func.func @_kl_kernel(%arg0: i32, %arg1: i32, %arg2: memref<8x128xf32, #tpu.memory_space<vmem>>, %arg3: memref<8x128xf32, #tpu.memory_space<vmem>>, %arg4: memref<8x128xf32, #tpu.memory_space<vmem>>) attributes {dimension_semantics = [#tpu.dimension_semantics<parallel>, #tpu.dimension_semantics<arbitrary>], iteration_bounds = array<i64: 1, 1>, scalar_prefetch = 0 : i64, scratch_operands = 0 : i64, tpu.core_type = #tpu.core_type<tc>, window_params = [{transform_indices = @transform_0, window_bounds = array<i64: 8, 128>}, {transform_indices = @transform_1, window_bounds = array<i64: 8, 128>}, {transform_indices = @transform_2, window_bounds = array<i64: 8, 128>}]} {
    %c0_i32 = arith.constant 0 : i32
    %0 = arith.cmpi eq, %arg1, %c0_i32 : i32
    %1 = arith.extui %0 : i1 to i32
    %c0_i32_0 = arith.constant 0 : i32
    %2 = arith.cmpi ne, %1, %c0_i32_0 : i32
    scf.if %2 {
      %cst = arith.constant 0.000000e+00 : f32
      %11 = vector.broadcast %cst : f32 to vector<8x128xf32>
      %c0 = arith.constant 0 : index
      %c0_5 = arith.constant 0 : index
      %12 = vector.load %arg4[%c0, %c0_5] : memref<8x128xf32, #tpu.memory_space<vmem>>, vector<8x128xf32>
      tpu.vector_store %arg4[%c0, %c0_5], %11 {strides = array<i32>} : memref<8x128xf32, #tpu.memory_space<vmem>>, vector<8x128xf32>,
    } else {
    }
    %c1_i32 = arith.constant 1 : i32
    %3 = arith.muli %arg0, %c1_i32 : i32
    %4 = arith.addi %3, %arg1 : i32
    %c0_i32_1 = arith.constant 0 : i32
    %5 = arith.cmpi slt, %4, %c0_i32_1 : i32
    %6 = arith.extui %5 : i1 to i32
    %c0_i32_2 = arith.constant 0 : i32
    %7 = arith.cmpi ne, %6, %c0_i32_2 : i32
    scf.if %7 {
      %c0 = arith.constant 0 : index
      %c0_5 = arith.constant 0 : index
      %11 = vector.load %arg2[%c0, %c0_5] : memref<8x128xf32, #tpu.memory_space<vmem>>, vector<8x128xf32>
      %c0_6 = arith.constant 0 : index
      %c0_7 = arith.constant 0 : index
      %12 = vector.load %arg3[%c0_6, %c0_7] : memref<8x128xf32, #tpu.memory_space<vmem>>, vector<8x128xf32>
      %cst = arith.constant 0.000000e+00 : f32
      %13 = vector.broadcast %cst : f32 to vector<8x128xf32>
      %14 = arith.cmpf ogt, %12, %13 : vector<8x128xf32>
      %cst_8 = arith.constant 1.000000e+00 : f32
      %15 = vector.broadcast %cst_8 : f32 to vector<8x128xf32>
      %16 = arith.select %14, %12, %15 : vector<8x128xi1>, vector<8x128xf32>
      %17 = math.log %16 : vector<8x128xf32>
      %18 = arith.subf %17, %11 : vector<8x128xf32>
      %19 = arith.mulf %12, %18 : vector<8x128xf32>
      %cst_9 = arith.constant 0.000000e+00 : f32
      %20 = vector.broadcast %cst_9 : f32 to vector<8x128xf32>
      %21 = arith.select %14, %19, %20 : vector<8x128xi1>, vector<8x128xf32>
      %c0_10 = arith.constant 0 : index
      %c0_11 = arith.constant 0 : index
      %22 = vector.load %arg4[%c0_10, %c0_11] : memref<8x128xf32, #tpu.memory_space<vmem>>, vector<8x128xf32>
      %23 = vector.shape_cast %21 : vector<8x128xf32> to vector<1x8x128xf32>
      %cst_12 = arith.constant dense<0.000000e+00> : vector<8x128xf32>
      %24 = vector.multi_reduction <add>, %23, %cst_12 [0] : vector<1x8x128xf32> to vector<8x128xf32>
      %25 = arith.addf %22, %24 : vector<8x128xf32>
      %c0_13 = arith.constant 0 : index
      %c0_14 = arith.constant 0 : index
      %26 = vector.load %arg4[%c0_13, %c0_14] : memref<8x128xf32, #tpu.memory_space<vmem>>, vector<8x128xf32>
      tpu.vector_store %arg4[%c0_13, %c0_14], %25 {strides = array<i32>} : memref<8x128xf32, #tpu.memory_space<vmem>>, vector<8x128xf32>,
    } else {
    }
    %c0_i32_3 = arith.constant 0 : i32
    %8 = arith.cmpi eq, %4, %c0_i32_3 : i32
    %9 = arith.extui %8 : i1 to i32
    %c0_i32_4 = arith.constant 0 : i32
    %10 = arith.cmpi ne, %9, %c0_i32_4 : i32
    scf.if %10 {
      %c0 = arith.constant 0 : index
      %c0_5 = arith.constant 0 : index
      %11 = vector.load %arg2[%c0, %c0_5] : memref<8x128xf32, #tpu.memory_space<vmem>>, vector<8x128xf32>
      %c0_6 = arith.constant 0 : index
      %c0_7 = arith.constant 0 : index
      %12 = vector.load %arg3[%c0_6, %c0_7] : memref<8x128xf32, #tpu.memory_space<vmem>>, vector<8x128xf32>
      %cst = arith.constant 0.000000e+00 : f32
      %13 = vector.broadcast %cst : f32 to vector<8x128xf32>
      %14 = arith.cmpf ogt, %12, %13 : vector<8x128xf32>
      %cst_8 = arith.constant 1.000000e+00 : f32
      %15 = vector.broadcast %cst_8 : f32 to vector<8x128xf32>
      %16 = arith.select %14, %12, %15 : vector<8x128xi1>, vector<8x128xf32>
      %17 = math.log %16 : vector<8x128xf32>
      %18 = arith.subf %17, %11 : vector<8x128xf32>
      %19 = arith.mulf %12, %18 : vector<8x128xf32>
      %cst_9 = arith.constant 0.000000e+00 : f32
      %20 = vector.broadcast %cst_9 : f32 to vector<8x128xf32>
      %21 = arith.select %14, %19, %20 : vector<8x128xi1>, vector<8x128xf32>
      %22 = tpu.iota {dimensions = array<i32: 0>} : vector<8x128xi32>
      %c2_i32 = arith.constant 2 : i32
      %23 = vector.broadcast %c2_i32 : i32 to vector<8x128xi32>
      %24 = arith.cmpi slt, %22, %23 : vector<8x128xi32>
      %cst_10 = arith.constant 0.000000e+00 : f32
      %25 = vector.broadcast %cst_10 : f32 to vector<8x128xf32>
      %26 = arith.select %24, %21, %25 : vector<8x128xi1>, vector<8x128xf32>
      %c0_11 = arith.constant 0 : index
      %c0_12 = arith.constant 0 : index
      %27 = vector.load %arg4[%c0_11, %c0_12] : memref<8x128xf32, #tpu.memory_space<vmem>>, vector<8x128xf32>
      %28 = vector.shape_cast %26 : vector<8x128xf32> to vector<1x8x128xf32>
      %cst_13 = arith.constant dense<0.000000e+00> : vector<8x128xf32>
      %29 = vector.multi_reduction <add>, %28, %cst_13 [0] : vector<1x8x128xf32> to vector<8x128xf32>
      %30 = arith.addf %27, %29 : vector<8x128xf32>
      %c0_14 = arith.constant 0 : index
      %c0_15 = arith.constant 0 : index
      %31 = vector.load %arg4[%c0_14, %c0_15] : memref<8x128xf32, #tpu.memory_space<vmem>>, vector<8x128xf32>
      tpu.vector_store %arg4[%c0_14, %c0_15], %30 {strides = array<i32>} : memref<8x128xf32, #tpu.memory_space<vmem>>, vector<8x128xf32>,
    } else {
    }
    return
  }
  func.func @transform_0(%arg0: i32, %arg1: i32) -> (i32, i32) {
    %c1_i32 = arith.constant 1 : i32
    %0 = arith.muli %arg0, %c1_i32 : i32
    %1 = arith.addi %0, %arg1 : i32
    %c0_i32 = arith.constant 0 : i32
    %2 = arith.minsi %1, %c0_i32 : i32
    %c0_i32_0 = arith.constant 0 : i32
    %c0_i32_1 = arith.constant 0 : i32
    return %2, %c0_i32_0 : i32, i32
  }
  func.func @transform_1(%arg0: i32, %arg1: i32) -> (i32, i32) {
    %c1_i32 = arith.constant 1 : i32
    %0 = arith.muli %arg0, %c1_i32 : i32
    %1 = arith.addi %0, %arg1 : i32
    %c0_i32 = arith.constant 0 : i32
    %2 = arith.minsi %1, %c0_i32 : i32
    %c0_i32_0 = arith.constant 0 : i32
    %c0_i32_1 = arith.constant 0 : i32
    return %2, %c0_i32_0 : i32, i32
  }
  func.func @transform_2(%arg0: i32, %arg1: i32) -> (i32, i32) {
    %c0_i32 = arith.constant 0 : i32
    %c0_i32_0 = arith.constant 0 : i32
    return %arg0, %c0_i32 : i32, i32
  }
}

</mosaic_0001>

<bundles_post_ra>
// kernel: tpu_custom_call.1
= control target key start
LH: loop header
LB: loop body
LE: loop exit
PB: predicated region body
PF: predicated region fallthrough
CT: control target
= control target key end

     0   :  { %7 = vsyncpa [#allocation3], 0  ;;  %s252_s0 = inlined_call_operand.hbm [shape: f32[2,128], index: 0, kind: input, shape index: {}]   ;;  %s253_s1 = inlined_call_operand.vmem [shape: f32[2,128], index: 1, kind: input, shape index: {}]   ;;  %s254_s2 = inlined_call_operand.hbm [shape: f32[8,128], index: 2, kind: output, shape index: {}]  }
   0x1   :  { %8 = vsyncpa [#allocation4], 0 }
   0x2   :  { %19 = vsyncadd [#allocation3], 96  ;;  %s206_s9 = smov [#allocation2]   ;;  %s158_s13 = scalar_lea.hbm %s252_s0, 32 }
   0x3   :  { %s24_s10 = sshll.u32 %s206_s9, 4  ;;  %p159_p0 = scmp.ne.s32.totalorder %s252_s0, %s158_s13  ;;  %s25_s10 = int_to_ptr.vmem [resolvable:$true] %s24_s10 }
   0x4   :  { %p162_p1 = scmp.lt.u32.totalorder %s158_s13, %s252_s0 }
   0x6   :  { %p164_p2 = pnand %p162_p1, %p159_p0 }
   0x8   :  { %167 = shalt.err (!%p164_p2)
}
   0x9   :  { %s168_s18 = scalar_lea.vmem %s25_s10, 32  ;;  %s172_s19 = scalar_lea.vmem %s25_s10, 128 }
   0xa   :  { %p169_p3 = scmp.ne.s32.totalorder %s25_s10, %s168_s18  ;;  %p173_p4 = scmp.lt.s32.totalorder %s25_s10, %s25_s10 }
   0xb   :  { %p174_p5 = scmp.lt.s32.totalorder %s172_s19, %s168_s18 }
   0xd   :  { %p175_p6 = por %p174_p5, %p173_p4 }
   0xf   :  { %p176_p7 = pnand %p175_p6, %p169_p3 }
  0x11   :  { %179 = shalt.err (!%p176_p7)
}
  0x12   :  { %s207_s20 = smov 32   ;;  %s208_s21 = smov 2  }
  0x13   :  { %30 = dma.hbm_to_vmem [thread:$0]  %s252_s0, 32, %s25_s10, [#allocation3], %s207_s20, %s207_s20, %s208_s21  }
  0x14   :  { %202 = dma.done.wait [#allocation3], 128  }
  0x15   :  { %203 = vsyncadd [#allocation3], 4294967168  ;;  %v112_v0 = vld [vmem:[%s253_s1] sm:$0xff]  ;;  %v120_v2 = vlaneseq  ;;  %s209_s26 = smov [#allocation5]  }
  0x16   :  { %vm113_vm0 = vcmp.gt.f32.partialorder %v112_v0, 0.0  ;;  %v111_v4 = vld [vmem:[#allocation2] sm:$0xff]  ;;  %s134_s27 = sshll.u32 %s209_s26, 4  ;;  %s135_s27 = int_to_ptr.vmem [resolvable:$true] %s134_s27 }
  0x17   :  { %v114_v1 = vsel %vm113_vm0, %v112_v0, 1.0  ;;  %v121_v6 = vshrl.u32 %v120_v2, 7  ;;  %s180_s0 = scalar_lea.vmem %s135_s27, 128  ;;  %p185_p9 = scmp.lt.s32.totalorder %s135_s27, %s135_s27 }
  0x18   :  { %156 = vlog2.f32 %v114_v1  ;;  %p181_p8 = scmp.ne.s32.totalorder %s135_s27, %s180_s0  ;;  %p186_p10 = scmp.lt.s32.totalorder %s180_s0, %s180_s0 }
  0x19   :  { %vm122_vm1 = vcmp.lt.s32.totalorder %v121_v6, 2 }
  0x1a   :  { %p187_p11 = por %p186_p10, %p185_p9 }
  0x1c   :  { %p188_p12 = pnand %p187_p11, %p181_p8 }
  0x22   :  { %v157_v3 = vpop.eup %156 }
  0x23   :  { %v116_v5 = vmul.f32 0.6931472, %v157_v3 }
  0x25   :  { %v117_v7 = vsub.f32 %v116_v5, %v111_v4 }
  0x27   :  { %v118_v8 = vmul.f32 %v117_v7, %v112_v0 }
  0x29   :  { %v119_v9 = vsel %vm113_vm0, %v118_v8, 0.0 }
  0x2a   :  { %v123_v10 = vsel %vm122_vm1, %v119_v9, 0.0 }
  0x2b   :  { %127 = vst [vmem:[#allocation5] sm:$0xff] %v123_v10 }
  0x2c   :  { %191 = shalt.err (!%p188_p12)
}
  0x2d   :  { %s192_s29 = scalar_lea.hbm %s254_s2, 128 }
  0x2e   :  { %p193_p13 = scmp.ne.s32.totalorder %s254_s2, %s192_s29  ;;  %p196_p0 = scmp.lt.u32.totalorder %s192_s29, %s254_s2 }
  0x30   :  { %p198_p1 = pnand %p196_p0, %p193_p13 }
  0x32   :  { %201 = shalt.err (!%p198_p1)
}
  0x33   :  { %137 = dma.vmem_to_hbm [thread:$0]  %s135_s27, 128, %s254_s2, [#allocation4]  }
  0x34   :  { %204 = dma.done.wait [#allocation4], 128  }
  0x35   :  { %205 = vsyncadd [#allocation4], 4294967168 }
  0x36   :  { %141 = vsyncpa [#allocation3], 1 }
  0x37   :  { %142 = vsyncpa [#allocation4], 1 }

</bundles_post_ra>
